<compile_context>
chip_gen: v7x
topology: tpu7x:2x2x1
jax: 0.10.0
libtpu: 0.0.40
codegen_flags: <defaults>
</compile_context>

<pallas_src>
import jax
import jax.numpy as jnp
from jax import lax
from jax.experimental import pallas as pl
from jax.experimental.pallas import tpu as pltpu

INPUT_DIM = 20
HIDDEN = 64
NUM_CLASSES = 10


def fcnn_kernel(x_ref, w1_ref, b1_ref, w2_ref, b2_ref, w3_ref, b3_ref, o_ref):
    # Cast x -> bf16 in-kernel (free on the VPU, no extra HBM round trip).
    x_bf = x_ref[...].astype(jnp.bfloat16)                      # (tb, 20)

    # Layer 1: contract the feature dim of both operands -> (64, tb), i.e.
    # batch lands on the lane axis.  Equivalent to relu(x @ W1^T + b1)^T.
    h1 = lax.dot_general(w1_ref[...], x_bf, (((1,), (1,)), ((), ())),
                         preferred_element_type=jnp.float32)    # (64, tb) f32
    h1 = jnp.maximum(h1 + b1_ref[...], 0.0)                     # f32 bias/ReLU

    # Layer 2: (64, 64) @ (64, tb) -> (64, tb)
    h2 = jnp.dot(w2_ref[...], h1.astype(jnp.bfloat16),
                 preferred_element_type=jnp.float32)
    h2 = jnp.maximum(h2 + b2_ref[...], 0.0)

    # Layer 3 (logits): (10, 64) @ (64, tb) -> (10, tb), lane-dense store.
    out = jnp.dot(w3_ref[...], h2.astype(jnp.bfloat16),
                  preferred_element_type=jnp.float32)
    o_ref[...] = (out + b3_ref[...]).astype(o_ref.dtype)


def _num_tensorcores():
    """Best-effort TensorCores per chip (2 on v7x, 1 on v5e/v6e)."""
    try:
        n = getattr(jax.devices()[0], "num_cores", None)
        if n is None:
            n = getattr(pltpu.get_tpu_info(), "num_cores", 1)
        return max(1, min(int(n), 2))
    except Exception:
        return 1


def _auto_batch_tile(B, num_cores, tb_cap=2048):
    """Batch tile: one big tile on 1-TC parts; an even, near-equal, 128-aligned
    split across TensorCores on 2-TC parts.  tb_cap is sweepable (1024-4096)."""
    if B <= 128:
        return B                                   # single tile (block == array)
    if num_cores <= 1 and B <= tb_cap:
        return B                                   # v5e/v6e: no forced split
    steps = pl.cdiv(B, tb_cap)
    if num_cores > 1:
        steps = max(steps, num_cores)
        steps = -(-steps // num_cores) * num_cores  # step count multiple of cores
    tb = -(-pl.cdiv(B, steps) // 128) * 128         # lane-aligned (128) tiles
    return min(tb, B)


def fcnn_forward(x, params, *, tb=None, num_cores=None, transpose_output=True):
    """Forward pass.  Returns (B, NUM_CLASSES) f32 logits (or (NUM_CLASSES, B)
    if transpose_output=False).  tb overrides the auto batch tile (sweepable)."""
    w1, b1, w2, b2, w3, b3 = params
    B = x.shape[0]

    if num_cores is None:
        num_cores = _num_tensorcores()
    if tb is None:
        tb = _auto_batch_tile(B, num_cores)
    else:
        tb = min(tb, B)
        if tb < B and tb % 128:
            tb = -(-tb // 128) * 128               # multi-step tiles lane-aligned
    grid = (pl.cdiv(B, tb),)

    # Weights/biases: full block, constant block index across the grid
    # (no re-DMA between steps).
    full = lambda a: pl.BlockSpec(a.shape, lambda i: (0,) * a.ndim)

    flops = 2 * B * (INPUT_DIM * HIDDEN + HIDDEN * HIDDEN + HIDDEN * NUM_CLASSES)
    bytes_accessed = (
        B * INPUT_DIM * 4                                # f32 x in (single pass)
        + (w1.size + w2.size + w3.size) * 2              # bf16 weights
        + (b1.size + b2.size + b3.size) * 4              # f32 biases
        + B * NUM_CLASSES * 4                            # f32 logits out
    )

    out_t = pl.pallas_call(
        fcnn_kernel,
        out_shape=jax.ShapeDtypeStruct((NUM_CLASSES, B), jnp.float32),
        grid_spec=pltpu.PrefetchScalarGridSpec(
            num_scalar_prefetch=0,
            grid=grid,
            in_specs=[
                pl.BlockSpec((tb, INPUT_DIM), lambda i: (i, 0)),   # x tile
                full(w1), full(b1),
                full(w2), full(b2),
                full(w3), full(b3),
            ],
            # Lane-dense output: batch tile on the 128-lane axis.
            out_specs=pl.BlockSpec((NUM_CLASSES, tb), lambda i: (0, i)),
        ),
        compiler_params=pltpu.CompilerParams(
            dimension_semantics=("parallel",)),
        cost_estimate=pl.CostEstimate(
            flops=flops, transcendentals=0, bytes_accessed=bytes_accessed),
    )(x, w1, b1, w2, b2, w3, b3)

    # Tiny (10, B) -> (B, 10) transpose to match the PyTorch interface; skip it
    # if the consumer accepts batch-on-lanes logits.
    return out_t.T if transpose_output else out_t


def init_params(key):
    """Deterministic init mimicking nn.Linear default U(-1/sqrt(fan_in), .).
    Weights stored bf16 in PyTorch (out, in) layout (cast ONCE here), biases
    f32 with shape (out, 1) for lane-broadcast in the transposed layout."""
    def linear(key, fan_in, fan_out):
        kw, kb = jax.random.split(key)
        bound = 1.0 / jnp.sqrt(fan_in)
        w = jax.random.uniform(kw, (fan_out, fan_in), jnp.float32, -bound, bound)
        b = jax.random.uniform(kb, (fan_out, 1), jnp.float32, -bound, bound)
        return w.astype(jnp.bfloat16), b

    k1, k2, k3 = jax.random.split(key, 3)
    w1, b1 = linear(k1, INPUT_DIM, HIDDEN)
    w2, b2 = linear(k2, HIDDEN, HIDDEN)
    w3, b3 = linear(k3, HIDDEN, NUM_CLASSES)
    return (w1, b1, w2, b2, w3, b3)


def fcnn_reference(x, params):
    """Reference with the same bf16 matmul operands / f32 accumulation.
    NOTE: vs. a pure-f32 PyTorch FCNN the bf16 operands give ~1e-2 agreement."""
    w1, b1, w2, b2, w3, b3 = params
    bf = jnp.bfloat16
    h1 = jnp.dot(x.astype(bf), w1.T, preferred_element_type=jnp.float32) + b1[:, 0]
    h1 = jnp.maximum(h1, 0.0)
    h2 = jnp.dot(h1.astype(bf), w2.T, preferred_element_type=jnp.float32) + b2[:, 0]
    h2 = jnp.maximum(h2, 0.0)
    return jnp.dot(h2.astype(bf), w3.T, preferred_element_type=jnp.float32) + b3[:, 0]


if __name__ == "__main__":
    key = jax.random.PRNGKey(0)
    kx1, kx2, kx3, kp = jax.random.split(key, 4)
    params = init_params(kp)

    # 1) Tiny batch: single tile (tb == B == 8).
    x_small = jax.random.normal(kx1, (8, INPUT_DIM), jnp.float32)
    out_small = jax.block_until_ready(fcnn_forward(x_small, params))
    assert out_small.shape == (8, NUM_CLASSES)
    assert jnp.allclose(out_small, fcnn_reference(x_small, params),
                        atol=1e-2, rtol=1e-2)

    # 2) Moderate batch: auto tiling (single tile on 1-TC parts, even 2-way
    #    128-aligned split on 2-TC parts).
    x_mid = jax.random.normal(kx2, (512, INPUT_DIM), jnp.float32)
    out_mid = jax.block_until_ready(fcnn_forward(x_mid, params))
    assert out_mid.shape == (512, NUM_CLASSES)
    assert jnp.allclose(out_mid, fcnn_reference(x_mid, params),
                        atol=1e-2, rtol=1e-2)

    # 3) Forced multi-step with a ragged tail (200 = 128 + 72): exercises the
    #    padded tail block and OOB-clipped lane-dense writeback.
    x_tail = jax.random.normal(kx3, (200, INPUT_DIM), jnp.float32)
    out_tail = jax.block_until_ready(fcnn_forward(x_tail, params, tb=128))
    assert out_tail.shape == (200, NUM_CLASSES)
    assert jnp.allclose(out_tail, fcnn_reference(x_tail, params),
                        atol=1e-2, rtol=1e-2)

    print("KERNEL_OK")
</pallas_src>

<mosaic_0001>
module attributes {stable_mosaic.version = 11 : i64} {
  func.func @fcnn_kernel(%arg0: i32, %arg1: memref<8x20xf32, #tpu.memory_space<vmem>>, %arg2: memref<64x20xbf16, #tpu.memory_space<vmem>>, %arg3: memref<64x1xf32, #tpu.memory_space<vmem>>, %arg4: memref<64x64xbf16, #tpu.memory_space<vmem>>, %arg5: memref<64x1xf32, #tpu.memory_space<vmem>>, %arg6: memref<10x64xbf16, #tpu.memory_space<vmem>>, %arg7: memref<10x1xf32, #tpu.memory_space<vmem>>, %arg8: memref<10x8xf32, #tpu.memory_space<vmem>>) attributes {dimension_semantics = [#tpu.dimension_semantics<parallel>], iteration_bounds = array<i64: 1>, scalar_prefetch = 0 : i64, scratch_operands = 0 : i64, tpu.core_type = #tpu.core_type<tc>, window_params = [{transform_indices = @transform_0, window_bounds = array<i64: 8, 20>}, {pipeline_mode = #tpu.pipeline_mode<synchronous>, transform_indices = @transform_1, window_bounds = array<i64: 64, 20>}, {pipeline_mode = #tpu.pipeline_mode<synchronous>, transform_indices = @transform_2, window_bounds = array<i64: 64, 1>}, {pipeline_mode = #tpu.pipeline_mode<synchronous>, transform_indices = @transform_3, window_bounds = array<i64: 64, 64>}, {pipeline_mode = #tpu.pipeline_mode<synchronous>, transform_indices = @transform_4, window_bounds = array<i64: 64, 1>}, {pipeline_mode = #tpu.pipeline_mode<synchronous>, transform_indices = @transform_5, window_bounds = array<i64: 10, 64>}, {pipeline_mode = #tpu.pipeline_mode<synchronous>, transform_indices = @transform_6, window_bounds = array<i64: 10, 1>}, {transform_indices = @transform_7, window_bounds = array<i64: 10, 8>}]} {
    %c0 = arith.constant 0 : index
    %c0_0 = arith.constant 0 : index
    %0 = vector.load %arg1[%c0, %c0_0] : memref<8x20xf32, #tpu.memory_space<vmem>>, vector<8x20xf32>
    %1 = arith.truncf %0 : vector<8x20xf32> to vector<8x20xbf16>
    %c0_1 = arith.constant 0 : index
    %c0_2 = arith.constant 0 : index
    %2 = vector.load %arg2[%c0_1, %c0_2] : memref<64x20xbf16, #tpu.memory_space<vmem>>, vector<64x20xbf16>
    %cst = arith.constant dense<0.000000e+00> : vector<64x8xf32>
    %3 = tpu.matmul %2, %1, %cst {dimension_numbers = #tpu.dot_dimension_numbers<[1], [1], [0], [0], [0, 0, 1, 0], [], []>} : vector<64x20xbf16>, vector<8x20xbf16>, vector<64x8xf32> -> vector<64x8xf32>
    %c0_3 = arith.constant 0 : index
    %c0_4 = arith.constant 0 : index
    %4 = vector.load %arg3[%c0_3, %c0_4] : memref<64x1xf32, #tpu.memory_space<vmem>>, vector<64x1xf32>
    %5 = vector.broadcast %4 : vector<64x1xf32> to vector<64x8xf32>
    %6 = arith.addf %3, %5 : vector<64x8xf32>
    %cst_5 = arith.constant 0.000000e+00 : f32
    %7 = vector.broadcast %cst_5 : f32 to vector<64x8xf32>
    %8 = arith.maximumf %6, %7 : vector<64x8xf32>
    %c0_6 = arith.constant 0 : index
    %c0_7 = arith.constant 0 : index
    %9 = vector.load %arg4[%c0_6, %c0_7] : memref<64x64xbf16, #tpu.memory_space<vmem>>, vector<64x64xbf16>
    %10 = arith.truncf %8 : vector<64x8xf32> to vector<64x8xbf16>
    %cst_8 = arith.constant dense<0.000000e+00> : vector<64x8xf32>
    %11 = tpu.matmul %9, %10, %cst_8 {dimension_numbers = #tpu.dot_dimension_numbers<[1], [0], [0], [1], [0, 0, 1, 1], [], []>} : vector<64x64xbf16>, vector<64x8xbf16>, vector<64x8xf32> -> vector<64x8xf32>
    %c0_9 = arith.constant 0 : index
    %c0_10 = arith.constant 0 : index
    %12 = vector.load %arg5[%c0_9, %c0_10] : memref<64x1xf32, #tpu.memory_space<vmem>>, vector<64x1xf32>
    %13 = vector.broadcast %12 : vector<64x1xf32> to vector<64x8xf32>
    %14 = arith.addf %11, %13 : vector<64x8xf32>
    %cst_11 = arith.constant 0.000000e+00 : f32
    %15 = vector.broadcast %cst_11 : f32 to vector<64x8xf32>
    %16 = arith.maximumf %14, %15 : vector<64x8xf32>
    %c0_12 = arith.constant 0 : index
    %c0_13 = arith.constant 0 : index
    %17 = vector.load %arg6[%c0_12, %c0_13] : memref<10x64xbf16, #tpu.memory_space<vmem>>, vector<10x64xbf16>
    %18 = arith.truncf %16 : vector<64x8xf32> to vector<64x8xbf16>
    %cst_14 = arith.constant dense<0.000000e+00> : vector<10x8xf32>
    %19 = tpu.matmul %17, %18, %cst_14 {dimension_numbers = #tpu.dot_dimension_numbers<[1], [0], [0], [1], [0, 0, 1, 1], [], []>} : vector<10x64xbf16>, vector<64x8xbf16>, vector<10x8xf32> -> vector<10x8xf32>
    %c0_15 = arith.constant 0 : index
    %c0_16 = arith.constant 0 : index
    %20 = vector.load %arg7[%c0_15, %c0_16] : memref<10x1xf32, #tpu.memory_space<vmem>>, vector<10x1xf32>
    %21 = vector.broadcast %20 : vector<10x1xf32> to vector<10x8xf32>
    %22 = arith.addf %19, %21 : vector<10x8xf32>
    %c0_17 = arith.constant 0 : index
    %c0_18 = arith.constant 0 : index
    %23 = vector.load %arg8[%c0_17, %c0_18] : memref<10x8xf32, #tpu.memory_space<vmem>>, vector<10x8xf32>
    tpu.vector_store %arg8[%c0_17, %c0_18], %22 {strides = array<i32>} : memref<10x8xf32, #tpu.memory_space<vmem>>, vector<10x8xf32>,
    return
  }
  func.func @transform_0(%arg0: i32) -> (i32, i32) {
    %c0_i32 = arith.constant 0 : i32
    %c0_i32_0 = arith.constant 0 : i32
    return %arg0, %c0_i32 : i32, i32
  }
  func.func @transform_1(%arg0: i32) -> (i32, i32) {
    %c0_i32 = arith.constant 0 : i32
    %c0_i32_0 = arith.constant 0 : i32
    %c0_i32_1 = arith.constant 0 : i32
    return %c0_i32, %c0_i32_0 : i32, i32
  }
  func.func @transform_2(%arg0: i32) -> (i32, i32) {
    %c0_i32 = arith.constant 0 : i32
    %c0_i32_0 = arith.constant 0 : i32
    %c0_i32_1 = arith.constant 0 : i32
    return %c0_i32, %c0_i32_0 : i32, i32
  }
  func.func @transform_3(%arg0: i32) -> (i32, i32) {
    %c0_i32 = arith.constant 0 : i32
    %c0_i32_0 = arith.constant 0 : i32
    %c0_i32_1 = arith.constant 0 : i32
    return %c0_i32, %c0_i32_0 : i32, i32
  }
  func.func @transform_4(%arg0: i32) -> (i32, i32) {
    %c0_i32 = arith.constant 0 : i32
    %c0_i32_0 = arith.constant 0 : i32
    %c0_i32_1 = arith.constant 0 : i32
    return %c0_i32, %c0_i32_0 : i32, i32
  }
  func.func @transform_5(%arg0: i32) -> (i32, i32) {
    %c0_i32 = arith.constant 0 : i32
    %c0_i32_0 = arith.constant 0 : i32
    %c0_i32_1 = arith.constant 0 : i32
    return %c0_i32, %c0_i32_0 : i32, i32
  }
  func.func @transform_6(%arg0: i32) -> (i32, i32) {
    %c0_i32 = arith.constant 0 : i32
    %c0_i32_0 = arith.constant 0 : i32
    %c0_i32_1 = arith.constant 0 : i32
    return %c0_i32, %c0_i32_0 : i32, i32
  }
  func.func @transform_7(%arg0: i32) -> (i32, i32) {
    %c0_i32 = arith.constant 0 : i32
    %c0_i32_0 = arith.constant 0 : i32
    return %c0_i32, %arg0 : i32, i32
  }
}

</mosaic_0001>

<bundles_post_ra>
// kernel: tpu_custom_call.1
= control target key start
LH: loop header
LB: loop body
LE: loop exit
PB: predicated region body
PF: predicated region fallthrough
CT: control target
= control target key end

     0   :  { %vm105_vm0 = vcmask 162816   ;;  %v524_v1 = vmov 0   ;;  %vm274_vm1 = vcmask 523264   ;;  %vm526_vm2 = vmmov 0   ;;  %s668_s0 = inlined_call_operand.vmem [shape: f32[8,20], index: 0, kind: input, shape index: {}]   ;;  %s669_s1 = inlined_call_operand.vmem [shape: bf16[64,20], index: 1, kind: input, shape index: {}]   ;;  %s670_s2 = inlined_call_operand.vmem [shape: f32[64,1], index: 2, kind: input, shape index: {}]   ;;  %s671_s4 = inlined_call_operand.vmem [shape: f32[64,1], index: 4, kind: input, shape index: {}]   ;;  %s672_s6 = inlined_call_operand.vmem [shape: f32[10,1], index: 6, kind: input, shape index: {}]   ;;  %s673_s3 = inlined_call_operand.vmem [shape: bf16[64,64], index: 3, kind: input, shape index: {}]   ;;  %s674_s5 = inlined_call_operand.vmem [shape: bf16[10,64], index: 5, kind: input, shape index: {}]   ;;  %s675_s7 = inlined_call_operand.vmem [shape: f32[10,8], index: 7, kind: output, shape index: {}]  }
   0x1   :  { %v27_v0 = vld [vmem:[%s668_s0] sm:$0xff]  ;;  %513 = vset.pattern.permute.xlu0 %v524_v1  ;;  %514 = vset.pattern.permute.xlu1 %v524_v1  ;;  %v39_v6 = vld [vmem:[%s670_s2 + $0x10] sm:$0xff]  ;;  %v38_v7 = vld [vmem:[%s670_s2 + $0x8] sm:$0xff]  ;;  %vm427_vm3 = vcmask 64512   ;;  %vm429_vm4 = vcmask 58368  }
   0x2   :  { %v28_v2 = vpack.c.bf16 %v27_v0, %v27_v0  ;;  %v515_v3 = vld [vmem:[%s669_s1] sm:$0xff]   ;;  %57 = vperm.xlu1 %514, %v39_v6   ;;  %v40_v8 = vld [vmem:[%s670_s2 + $0x18] sm:$0xff]  ;;  %v516_v9 = vld [vmem:[%s669_s1 + $0x8] sm:$0xff]  }
   0x3   :  { %473 = vmatprep.mubr.msk.bf16.mxu0 %vm105_vm0, %v515_v3  ;;  %v37_v5 = vld [vmem:[%s670_s2] sm:$0xff]  ;;  %v517_v10 = vld [vmem:[%s669_s1 + $0x10] sm:$0xff]   ;;  %v42_v12 = vld [vmem:[%s670_s2 + $0x28] sm:$0xff] }
   0x4   :  { %509 = vmatprep.subr.msk.bf16.mxu0 %vm105_vm0, %v28_v2  ;;  %v119_v4 = vsel %vm105_vm0, %v28_v2, 0  ;;  %47 = vperm.xlu0 %513, %v37_v5   ;;  %v41_v11 = vld [vmem:[%s670_s2 + $0x20] sm:$0xff]  ;;  %v43_v13 = vld [vmem:[%s670_s2 + $0x30] sm:$0xff]  ;;  %v44_v14 = vld [vmem:[%s670_s2 + $0x38] sm:$0xff]  ;;  %v525_v2 = vmov 0.0  }
   0x5   :  { %472 = vmatpush3.bf16.xpose.msra.mxu0 %v119_v4  ;;  %v518_v15 = vld [vmem:[%s669_s1 + $0x18] sm:$0xff]   ;;  %v206_v16 = vld [vmem:[%s671_s4] sm:$0xff]  ;;  %v207_v17 = vld [vmem:[%s671_s4 + $0x8] sm:$0xff] }
   0x6   :  { %62 = vperm.xlu1 %514, %v40_v8   ;;  %v208_v18 = vld [vmem:[%s671_s4 + $0x10] sm:$0xff]  ;;  %v209_v19 = vld [vmem:[%s671_s4 + $0x18] sm:$0xff]  ;;  %v210_v20 = vld [vmem:[%s671_s4 + $0x20] sm:$0xff]  ;;  %497 = vmatprep.subr.bf16.mxu0 %v525_v2 }
   0x7   :  { %v211_v21 = vld [vmem:[%s671_s4 + $0x28] sm:$0xff]  ;;  %v212_v22 = vld [vmem:[%s671_s4 + $0x30] sm:$0xff]  ;;  %v213_v23 = vld [vmem:[%s671_s4 + $0x38] sm:$0xff] }
   0x8   :  { %52 = vperm.xlu0 %513, %v38_v7   ;;  %v366_v24 = vld [vmem:[%s672_s6] sm:$0xff]  ;;  %v367_v25 = vld [vmem:[%s672_s6 + $0x8] sm:$0x3]  ;;  %v521_v0 = vld [vmem:[%s673_s3 + $0x10] sm:$0xff]  }
   0x9   :  { %v519_v26 = vld [vmem:[%s673_s3] sm:$0xff]   ;;  %v520_v63 = vld [vmem:[%s673_s3 + $0x8] sm:$0xff]   ;;  %v522_v1 = vld [vmem:[%s673_s3 + $0x18] sm:$0xff]  }
   0xa   :  { %72 = vperm.xlu1 %514, %v42_v12   ;;  %489 = vmatprep.mubr.msk.bf16.mxu1 %vm274_vm1, %v519_v26 }
   0xc   :  { %474 = vmatmul.mubr.msk.bf16.vlgmr.msra.gmra.mrb[0].mxu0 %vm105_vm0, %v516_v9  ;;  %67 = vperm.xlu0 %513, %v41_v11  }
   0xd   :  { %477 = vmatprep.mubr.msk.bf16.mxu0 %vm105_vm0, %v517_v10 }
   0xe   :  { %82 = vperm.xlu1 %514, %v44_v14  }
  0x10   :  { %77 = vperm.xlu0 %513, %v43_v13  }
  0x12   :  { %221 = vperm.xlu1 %514, %v207_v17  }
  0x14   :  { %478 = vmatmul.mubr.msk.bf16.gmra.mrb[4].mxu0 %vm105_vm0, %v518_v15  ;;  %216 = vperm.xlu0 %513, %v206_v16  }
  0x15   :  { %505 = vmatprep.mubr.msk.bf16.mxu0 %vm526_vm2, %v525_v2 }
  0x16   :  { %231 = vperm.xlu1 %514, %v209_v19  }
  0x18   :  { %226 = vperm.xlu0 %513, %v208_v18  }
  0x1a   :  { %241 = vperm.xlu1 %514, %v211_v21  }
  0x1c   :  { %236 = vperm.xlu0 %513, %v210_v20  }
  0x1e   :  { %251 = vperm.xlu1 %514, %v213_v23  }
  0x20   :  { %246 = vperm.xlu0 %513, %v212_v22  }
  0x22   :  { %375 = vperm.xlu1 %514, %v367_v25  }
  0x24   :  { %370 = vperm.xlu0 %513, %v366_v24  }
  0x81   :  { %v58_v28 = vpop.permute.xlu1 %57 }
  0x83   :  { %v48_v27 = vpop.permute.xlu0 %47 }
  0x85   :  { %v63_v30 = vpop.permute.xlu1 %62 }
  0x87   :  { %v53_v29 = vpop.permute.xlu0 %52 }
  0x89   :  { %v73_v39 = vpop.permute.xlu1 %72 }
  0x8b   :  { %v68_v34 = vpop.permute.xlu0 %67 }
  0x8d   :  { %v83_v51 = vpop.permute.xlu1 %82 }
  0x8f   :  { %v78_v46 = vpop.permute.xlu0 %77 }
  0x91   :  { %v222_v4 = vpop.permute.xlu1 %221 }
  0x93   :  { %v217_v3 = vpop.permute.xlu0 %216 }
  0x95   :  { %v232_v6 = vpop.permute.xlu1 %231 }
  0x97   :  { %v227_v5 = vpop.permute.xlu0 %226 }
  0x99   :  { %v242_v15 = vpop.permute.xlu1 %241 }
  0x9b   :  { %v237_v10 = vpop.permute.xlu0 %236 }
  0x9f   :  { %v247_v22 = vpop.permute.xlu0 %246 }
  0xdf   :  { %v475_v31 = vpop.f32.mrb[0].mxu0 }
  0xe0   :  { %v164_v32 = vadd.f32 %v475_v31, %v58_v28  ;;  %v155_v33 = vpop.f32.mrb[1].mxu0 }
  0xe1   :  { %v156_v35 = vadd.f32 %v155_v33, %v48_v27  ;;  %v476_v36 = vpop.f32.mrb[2].mxu0  ;;  %v252_v27 = vpop.permute.xlu1 %251 }
  0xe2   :  { %v167_v37 = vadd.f32 %v476_v36, %v63_v30  ;;  %v158_v38 = vpop.f32.mrb[3].mxu0  ;;  %v188_v41 = vmax.f32 %v164_v32, 0.0 }
  0xe3   :  { %v159_v40 = vadd.f32 %v158_v38, %v53_v29  ;;  %v186_v43 = vmax.f32 %v156_v35, 0.0 }
  0xe4   :  { %v189_v42 = vmax.f32 %v167_v37, 0.0 }
  0xe5   :  { %v187_v44 = vmax.f32 %v159_v40, 0.0  ;;  %v371_v40 = vpop.permute.xlu0 %370 }
  0xe6   :  { %v203_v45 = vpack.c.bf16 %v189_v42, %v188_v41 }
  0xe7   :  { %v479_v47 = vpop.f32.mrb[4].mxu0  ;;  %v202_v48 = vpack.c.bf16 %v187_v44, %v186_v43  ;;  %v376_v44 = vpop.permute.xlu1 %375 }
  0xe8   :  { %v180_v49 = vadd.f32 %v479_v47, %v78_v46  ;;  %v171_v50 = vpop.f32.mrb[5].mxu0 }
  0xe9   :  { %v172_v52 = vadd.f32 %v171_v50, %v68_v34  ;;  %v480_v53 = vpop.f32.mrb[6].mxu0  ;;  %481 = vmatprep.subr.bf16.mxu1 %v202_v48 }
  0xea   :  { %v183_v54 = vadd.f32 %v480_v53, %v83_v51  ;;  %v174_v55 = vpop.f32.mrb[7].mxu0  ;;  %482 = vmatpush3.bf16.msra.mxu1 %v202_v48  ;;  %v192_v57 = vmax.f32 %v180_v49, 0.0 }
  0xeb   :  { %v175_v56 = vadd.f32 %v174_v55, %v73_v39  ;;  %483 = vmatprep.subr.bf16.mxu1 %v203_v45  ;;  %v190_v59 = vmax.f32 %v172_v52, 0.0  ;;  %v523_v39 = vld [vmem:[%s674_s5] sm:$0x1f]  }
  0xec   :  { %v193_v58 = vmax.f32 %v183_v54, 0.0 }
  0xed   :  { %v191_v60 = vmax.f32 %v175_v56, 0.0 }
  0xee   :  { %v205_v61 = vpack.c.bf16 %v193_v58, %v192_v57  ;;  %484 = vmatpush3.bf16.msra.mxu1 %v203_v45 }
  0xef   :  { %v204_v62 = vpack.c.bf16 %v191_v60, %v190_v59 }
  0xf1   :  { %485 = vmatprep.subr.bf16.mxu1 %v204_v62 }
  0xf2   :  { %486 = vmatpush3.bf16.msra.mxu1 %v204_v62 }
  0xf3   :  { %487 = vmatprep.subr.bf16.mxu1 %v205_v61 }
  0xf6   :  { %488 = vmatpush3.bf16.msra.mxu1 %v205_v61 }
  0xf9   :  { %490 = vmatmul.mubr.msk.bf16.vlgmr.msra.gmra.mrb[0].mxu1 %vm274_vm1, %v520_v63 }
  0xfa   :  { %493 = vmatprep.mubr.msk.bf16.mxu1 %vm274_vm1, %v521_v0 }
 0x101   :  { %494 = vmatmul.mubr.msk.bf16.gmra.mrb[4].mxu1 %vm274_vm1, %v522_v1 }
 0x1cc   :  { %v491_v7 = vpop.f32.mrb[0].mxu1 }
 0x1cd   :  { %v330_v8 = vadd.f32 %v491_v7, %v227_v5  ;;  %v321_v9 = vpop.f32.mrb[1].mxu1 }
 0x1ce   :  { %v322_v11 = vadd.f32 %v321_v9, %v217_v3  ;;  %v492_v12 = vpop.f32.mrb[2].mxu1 }
 0x1cf   :  { %v333_v13 = vadd.f32 %v492_v12, %v232_v6  ;;  %v324_v14 = vpop.f32.mrb[3].mxu1  ;;  %v354_v17 = vmax.f32 %v330_v8, 0.0 }
 0x1d0   :  { %v325_v16 = vadd.f32 %v324_v14, %v222_v4  ;;  %v352_v19 = vmax.f32 %v322_v11, 0.0 }
 0x1d1   :  { %v355_v18 = vmax.f32 %v333_v13, 0.0 }
 0x1d2   :  { %v353_v20 = vmax.f32 %v325_v16, 0.0 }
 0x1d3   :  { %v363_v21 = vpack.c.bf16 %v355_v18, %v354_v17 }
 0x1d4   :  { %v362_v23 = vpack.c.bf16 %v353_v20, %v352_v19  ;;  %v495_v24 = vpop.f32.mrb[4].mxu1 }
 0x1d5   :  { %v346_v25 = vadd.f32 %v495_v24, %v247_v22  ;;  %v337_v26 = vpop.f32.mrb[5].mxu1 }
 0x1d6   :  { %v338_v28 = vadd.f32 %v337_v26, %v237_v10  ;;  %v496_v29 = vpop.f32.mrb[6].mxu1  ;;  %498 = vmatpush3.bf16.msra.mxu0 %v362_v23 }
 0x1d7   :  { %v349_v30 = vadd.f32 %v496_v29, %v252_v27  ;;  %v340_v31 = vpop.f32.mrb[7].mxu1  ;;  %499 = vmatprep.subr.bf16.mxu0 %v525_v2  ;;  %v358_v33 = vmax.f32 %v346_v25, 0.0 }
 0x1d8   :  { %v341_v32 = vadd.f32 %v340_v31, %v242_v15  ;;  %v356_v35 = vmax.f32 %v338_v28, 0.0 }
 0x1d9   :  { %v359_v34 = vmax.f32 %v349_v30, 0.0 }
 0x1da   :  { %v357_v36 = vmax.f32 %v341_v32, 0.0  ;;  %500 = vmatpush3.bf16.msra.mxu0 %v363_v21 }
 0x1db   :  { %v365_v37 = vpack.c.bf16 %v359_v34, %v358_v33  ;;  %501 = vmatprep.subr.bf16.mxu0 %v525_v2 }
 0x1dc   :  { %v364_v38 = vpack.c.bf16 %v357_v36, %v356_v35 }
 0x1de   :  { %502 = vmatpush3.bf16.msra.mxu0 %v364_v38 }
 0x1df   :  { %503 = vmatprep.subr.bf16.mxu0 %v525_v2 }
 0x1e2   :  { %504 = vmatpush3.bf16.msra.mxu0 %v365_v37 }
 0x1e5   :  { %506 = vmatmul.mubr.msk.bf16.vlgmr.msra.gmra.mrb[8].mxu0 %vm274_vm1, %v523_v39 }
 0x2b8   :  { %v420_v41 = vpop.f32.mrb[8].mxu0 }
 0x2b9   :  { %v421_v42 = vadd.f32 %v420_v41, %v371_v40  ;;  %v507_v43 = vpop.f32.mrb[9].mxu0 }
 0x2ba   :  { %v423_v45 = vpop.f32.mrb[10].mxu0 }
 0x2bb   :  { %428 = vst.msk [vmem:[%s675_s7] sm:$0xff] %vm427_vm3, %v421_v42  ;;  %v424_v46 = vadd.f32 %v423_v45, %v376_v44  ;;  %v508_v47 = vpop.f32.mrb[11].mxu0 }
 0x2bd   :  { %430 = vst.msk [vmem:[%s675_s7 + $0x8] sm:$0x3] %vm429_vm4, %v424_v46 }

</bundles_post_ra>
